<compile_context>
chip_gen: v7x
topology: tpu7x:2x2x1
jax: 0.10.0
libtpu: 0.0.40
codegen_flags: <defaults>
</compile_context>

<pallas_src>
import math
from functools import partial

import jax
import jax.numpy as jnp
from jax.experimental import pallas as pl
from jax.experimental.pallas import tpu as pltpu

LANES = 128
TARGET_BLOCK_BYTES = 4 * 1024 * 1024   # ~4 MiB per input block (per buffer)
VMEM_LIMIT_BYTES = 32 * 1024 * 1024    # covers 2 inputs x 2 buffers x 4 MiB + headroom


def _cdiv(a, b):
    return (a + b - 1) // b


def _num_core_splits():
    """2 on chips with two TensorCores (v7x), else 1 (v5e / v6e / others)."""
    try:
        kind = jax.devices()[0].device_kind.lower()
    except Exception:
        return 1
    return 2 if ("v7" in kind or "tpu7" in kind) else 1


def _masked_mse_kernel(pred_ref, target_ref, sum_ref, cnt_ref, *,
                       tile_rows, acc_rows, tiles_per_core, rows,
                       first_masked_tile, needs_bounds_mask):
    c = pl.program_id(0)   # core-split axis (CORE_PARALLEL on 2-TC chips)
    j = pl.program_id(1)   # row-tile index within this core's range (arbitrary)

    @pl.when(j == 0)
    def _():
        sum_ref[...] = jnp.zeros_like(sum_ref)
        cnt_ref[...] = jnp.zeros_like(cnt_ref)

    # Native-dtype compare; cast to f32 only for the arithmetic.
    t_nat = target_ref[...]
    mask = t_nat > 0
    t = t_nat.astype(jnp.float32)
    p = pred_ref[...].astype(jnp.float32)

    groups = tile_rows // acc_rows

    def accumulate(maskf, sq):
        # vreg-wise partial reduction into (acc_rows, 128) resident outputs:
        # `groups` independent VPU add chains per accumulator, no XLU reduce.
        sum_ref[...] += sq.reshape(groups, acc_rows, LANES).sum(axis=0).reshape(
            1, acc_rows, LANES)
        cnt_ref[...] += maskf.reshape(groups, acc_rows, LANES).sum(axis=0).reshape(
            1, acc_rows, LANES)

    def fast_path():
        # Full tile: all rows are real data (finite), multiply-mask is safe.
        maskf = mask.astype(jnp.float32)
        diff = (t - p) * maskf
        accumulate(maskf, diff * diff)

    if not needs_bounds_mask:
        fast_path()
    else:
        logical_tile = c * tiles_per_core + j

        @pl.when(logical_tile < first_masked_tile)
        def _():
            fast_path()

        @pl.when(logical_tile >= first_masked_tile)
        def _():
            # Partial last tile / phantom tiles: row-only bounds test
            # (lane-tail elements were zero-padded -> already fail t > 0).
            row = jax.lax.broadcasted_iota(jnp.int32, (tile_rows, LANES), 0)
            rows_left = rows - logical_tile * tile_rows   # <= 0 for phantoms
            full_mask = jnp.logical_and(mask, row < rows_left)
            maskf = full_mask.astype(jnp.float32)
            # where(): out-of-bounds garbage rows cannot leak NaN/Inf.
            diff = jnp.where(full_mask, t - p, 0.0)
            accumulate(maskf, diff * diff)


def masked_mse_loss(pred, target):
    assert pred.ndim == target.ndim, "inconsistent dimensions"
    assert pred.shape == target.shape

    n = int(math.prod(pred.shape))
    pred_f = pred.reshape(-1)
    target_f = target.reshape(-1)

    rows = _cdiv(n, LANES)
    padded = rows * LANES
    if padded != n:
        # Lane-tail zero pad (the bounds-mask fast path relies on this: padded
        # elements fail t > 0). Costs an extra HBM copy of both tensors.
        pred_f = jnp.pad(pred_f, (0, padded - n))
        target_f = jnp.pad(target_f, (0, padded - n))
    pred2d = pred_f.reshape(rows, LANES)
    target2d = target_f.reshape(rows, LANES)

    # Sublane multiple for the native dtype (f32: 8, bf16/f16: 16, int8: 32).
    itemsize = jnp.dtype(pred2d.dtype).itemsize
    sublane = max(8, 32 // max(1, itemsize))
    # ~4 MiB blocks regardless of dtype (8192 rows f32, 16384 rows bf16).
    max_tile_rows = max(sublane, TARGET_BLOCK_BYTES // (LANES * itemsize))
    tile_rows = min(max_tile_rows, _cdiv(rows, sublane) * sublane)

    # Widest accumulator (<=64 rows) that divides the tile.
    acc_rows = 8
    for cand in (64, 32, 16):
        if tile_rows % cand == 0:
            acc_rows = cand
            break

    tiles_total = _cdiv(rows, tile_rows)
    num_splits = min(_num_core_splits(), tiles_total)
    tiles_per_core = _cdiv(tiles_total, num_splits)
    max_tile_idx = tiles_total - 1
    has_phantom = num_splits * tiles_per_core > tiles_total

    # ROW coverage test (not element coverage): lane-tail is handled by the pad.
    covered_rows = num_splits * tiles_per_core * tile_rows
    needs_bounds_mask = covered_rows > rows
    last_partial = (rows % tile_rows) != 0
    first_masked_tile = tiles_total - 1 if last_partial else tiles_total

    def data_index_map(c, j):
        tile = c * tiles_per_core + j
        if has_phantom:
            # Clamp phantom tiles (second core's over-run) to a valid block;
            # their contribution is zeroed by the in-kernel row mask.
            tile = jnp.minimum(tile, max_tile_idx)
        return (tile, 0)

    kernel = partial(
        _masked_mse_kernel,
        tile_rows=tile_rows,
        acc_rows=acc_rows,
        tiles_per_core=tiles_per_core,
        rows=rows,
        first_masked_tile=first_masked_tile,
        needs_bounds_mask=needs_bounds_mask,
    )

    if num_splits > 1 and hasattr(pltpu, "CORE_PARALLEL"):
        # Only CORE_PARALLEL actually shards the grid axis across TensorCores.
        dim_sems = (pltpu.CORE_PARALLEL, pltpu.ARBITRARY)
    elif num_splits > 1:
        dim_sems = ("parallel", "arbitrary")
    else:
        dim_sems = ("arbitrary", "arbitrary")

    out_sum, out_cnt = pl.pallas_call(
        kernel,
        out_shape=(
            jax.ShapeDtypeStruct((num_splits, acc_rows, LANES), jnp.float32),
            jax.ShapeDtypeStruct((num_splits, acc_rows, LANES), jnp.float32),
        ),
        grid_spec=pltpu.PrefetchScalarGridSpec(
            num_scalar_prefetch=0,
            grid=(num_splits, tiles_per_core),
            in_specs=[
                pl.BlockSpec((tile_rows, LANES), data_index_map),
                pl.BlockSpec((tile_rows, LANES), data_index_map),
            ],
            out_specs=(
                pl.BlockSpec((1, acc_rows, LANES), lambda c, j: (c, 0, 0)),
                pl.BlockSpec((1, acc_rows, LANES), lambda c, j: (c, 0, 0)),
            ),
        ),
        compiler_params=pltpu.CompilerParams(
            dimension_semantics=dim_sems,
            vmem_limit_bytes=VMEM_LIMIT_BYTES,
        ),
    )(pred2d, target2d)

    # Tiny final reduce + divide over the (num_splits, acc_rows, 128) partials.
    # 0/0 -> NaN matches torch's mean over an empty selection.
    return jnp.sum(out_sum) / jnp.sum(out_cnt)


def _reference(pred, target):
    mask = target > 0
    diff = jnp.where(mask, target - pred, 0.0)
    return jnp.sum(diff * diff) / jnp.sum(mask.astype(jnp.float32))


if __name__ == "__main__":
    key = jax.random.PRNGKey(0)
    k1, k2 = jax.random.split(key)
    # NCHW, small shapes
    pred = jax.random.normal(k1, (2, 4, 16, 16), dtype=jnp.float32)
    # target has both positive (valid) and non-positive (masked) entries
    target = jax.random.normal(k2, (2, 4, 16, 16), dtype=jnp.float32)

    loss = masked_mse_loss(pred, target)
    jax.block_until_ready(loss)

    ref = _reference(pred, target)
    assert jnp.allclose(loss, ref, rtol=1e-5, atol=1e-6), (loss, ref)
    print("KERNEL_OK")
</pallas_src>

<mosaic_0001>
module attributes {stable_mosaic.version = 11 : i64} {
  func.func @_masked_mse_kernel(%arg0: i32, %arg1: i32, %arg2: memref<16x128xf32, #tpu.memory_space<vmem>>, %arg3: memref<16x128xf32, #tpu.memory_space<vmem>>, %arg4: memref<1x16x128xf32, #tpu.memory_space<vmem>>, %arg5: memref<1x16x128xf32, #tpu.memory_space<vmem>>) attributes {dimension_semantics = [#tpu.dimension_semantics<arbitrary>, #tpu.dimension_semantics<arbitrary>], iteration_bounds = array<i64: 1, 1>, scalar_prefetch = 0 : i64, scratch_operands = 0 : i64, tpu.core_type = #tpu.core_type<tc>, window_params = [{transform_indices = @transform_0, window_bounds = array<i64: 16, 128>}, {transform_indices = @transform_1, window_bounds = array<i64: 16, 128>}, {transform_indices = @transform_2, window_bounds = array<i64: 1, 16, 128>}, {transform_indices = @transform_3, window_bounds = array<i64: 1, 16, 128>}]} {
    %c0_i32 = arith.constant 0 : i32
    %0 = arith.cmpi eq, %arg1, %c0_i32 : i32
    %1 = arith.extui %0 : i1 to i32
    %c0_i32_0 = arith.constant 0 : i32
    %2 = arith.cmpi ne, %1, %c0_i32_0 : i32
    scf.if %2 {
      %cst_18 = arith.constant 0.000000e+00 : f32
      %24 = vector.broadcast %cst_18 : f32 to vector<1x16x128xf32>
      %c0_19 = arith.constant 0 : index
      %c0_20 = arith.constant 0 : index
      %c0_21 = arith.constant 0 : index
      %25 = vector.load %arg4[%c0_19, %c0_20, %c0_21] : memref<1x16x128xf32, #tpu.memory_space<vmem>>, vector<1x16x128xf32>
      tpu.vector_store %arg4[%c0_19, %c0_20, %c0_21], %24 {strides = array<i32>} : memref<1x16x128xf32, #tpu.memory_space<vmem>>, vector<1x16x128xf32>,
      %cst_22 = arith.constant 0.000000e+00 : f32
      %26 = vector.broadcast %cst_22 : f32 to vector<1x16x128xf32>
      %c0_23 = arith.constant 0 : index
      %c0_24 = arith.constant 0 : index
      %c0_25 = arith.constant 0 : index
      %27 = vector.load %arg5[%c0_23, %c0_24, %c0_25] : memref<1x16x128xf32, #tpu.memory_space<vmem>>, vector<1x16x128xf32>
      tpu.vector_store %arg5[%c0_23, %c0_24, %c0_25], %26 {strides = array<i32>} : memref<1x16x128xf32, #tpu.memory_space<vmem>>, vector<1x16x128xf32>,
    } else {
    }
    %c0 = arith.constant 0 : index
    %c0_1 = arith.constant 0 : index
    %3 = vector.load %arg3[%c0, %c0_1] : memref<16x128xf32, #tpu.memory_space<vmem>>, vector<16x128xf32>
    %cst = arith.constant 0.000000e+00 : f32
    %4 = vector.broadcast %cst : f32 to vector<16x128xf32>
    %5 = arith.cmpf ogt, %3, %4 : vector<16x128xf32>
    %c0_2 = arith.constant 0 : index
    %c0_3 = arith.constant 0 : index
    %6 = vector.load %arg2[%c0_2, %c0_3] : memref<16x128xf32, #tpu.memory_space<vmem>>, vector<16x128xf32>
    %7 = arith.extui %5 : vector<16x128xi1> to vector<16x128xi32>
    %8 = arith.sitofp %7 : vector<16x128xi32> to vector<16x128xf32>
    %9 = arith.subf %3, %6 : vector<16x128xf32>
    %10 = arith.mulf %9, %8 : vector<16x128xf32>
    %11 = arith.mulf %10, %10 : vector<16x128xf32>
    %c0_4 = arith.constant 0 : index
    %c0_5 = arith.constant 0 : index
    %c0_6 = arith.constant 0 : index
    %12 = vector.load %arg4[%c0_4, %c0_5, %c0_6] : memref<1x16x128xf32, #tpu.memory_space<vmem>>, vector<1x16x128xf32>
    %13 = vector.shape_cast %11 : vector<16x128xf32> to vector<1x16x128xf32>
    %cst_7 = arith.constant dense<0.000000e+00> : vector<16x128xf32>
    %14 = vector.multi_reduction <add>, %13, %cst_7 [0] : vector<1x16x128xf32> to vector<16x128xf32>
    %15 = vector.shape_cast %14 : vector<16x128xf32> to vector<1x16x128xf32>
    %16 = arith.addf %12, %15 : vector<1x16x128xf32>
    %c0_8 = arith.constant 0 : index
    %c0_9 = arith.constant 0 : index
    %c0_10 = arith.constant 0 : index
    %17 = vector.load %arg4[%c0_8, %c0_9, %c0_10] : memref<1x16x128xf32, #tpu.memory_space<vmem>>, vector<1x16x128xf32>
    tpu.vector_store %arg4[%c0_8, %c0_9, %c0_10], %16 {strides = array<i32>} : memref<1x16x128xf32, #tpu.memory_space<vmem>>, vector<1x16x128xf32>,
    %c0_11 = arith.constant 0 : index
    %c0_12 = arith.constant 0 : index
    %c0_13 = arith.constant 0 : index
    %18 = vector.load %arg5[%c0_11, %c0_12, %c0_13] : memref<1x16x128xf32, #tpu.memory_space<vmem>>, vector<1x16x128xf32>
    %19 = vector.shape_cast %8 : vector<16x128xf32> to vector<1x16x128xf32>
    %cst_14 = arith.constant dense<0.000000e+00> : vector<16x128xf32>
    %20 = vector.multi_reduction <add>, %19, %cst_14 [0] : vector<1x16x128xf32> to vector<16x128xf32>
    %21 = vector.shape_cast %20 : vector<16x128xf32> to vector<1x16x128xf32>
    %22 = arith.addf %18, %21 : vector<1x16x128xf32>
    %c0_15 = arith.constant 0 : index
    %c0_16 = arith.constant 0 : index
    %c0_17 = arith.constant 0 : index
    %23 = vector.load %arg5[%c0_15, %c0_16, %c0_17] : memref<1x16x128xf32, #tpu.memory_space<vmem>>, vector<1x16x128xf32>
    tpu.vector_store %arg5[%c0_15, %c0_16, %c0_17], %22 {strides = array<i32>} : memref<1x16x128xf32, #tpu.memory_space<vmem>>, vector<1x16x128xf32>,
    return
  }
  func.func @transform_0(%arg0: i32, %arg1: i32) -> (i32, i32) {
    %c1_i32 = arith.constant 1 : i32
    %0 = arith.muli %arg0, %c1_i32 : i32
    %1 = arith.addi %0, %arg1 : i32
    %c0_i32 = arith.constant 0 : i32
    %c0_i32_0 = arith.constant 0 : i32
    return %1, %c0_i32 : i32, i32
  }
  func.func @transform_1(%arg0: i32, %arg1: i32) -> (i32, i32) {
    %c1_i32 = arith.constant 1 : i32
    %0 = arith.muli %arg0, %c1_i32 : i32
    %1 = arith.addi %0, %arg1 : i32
    %c0_i32 = arith.constant 0 : i32
    %c0_i32_0 = arith.constant 0 : i32
    return %1, %c0_i32 : i32, i32
  }
  func.func @transform_2(%arg0: i32, %arg1: i32) -> (i32, i32, i32) {
    %c0_i32 = arith.constant 0 : i32
    %c0_i32_0 = arith.constant 0 : i32
    %c0_i32_1 = arith.constant 0 : i32
    return %arg0, %c0_i32, %c0_i32_0 : i32, i32, i32
  }
  func.func @transform_3(%arg0: i32, %arg1: i32) -> (i32, i32, i32) {
    %c0_i32 = arith.constant 0 : i32
    %c0_i32_0 = arith.constant 0 : i32
    %c0_i32_1 = arith.constant 0 : i32
    return %arg0, %c0_i32, %c0_i32_0 : i32, i32, i32
  }
}

</mosaic_0001>

<bundles_post_ra>
// kernel: tpu_custom_call.1
= control target key start
LH: loop header
LB: loop body
LE: loop exit
PB: predicated region body
PF: predicated region fallthrough
CT: control target
= control target key end

     0   :  { %9 = vsyncpa [#allocation3], 0  ;;  %s321_s0 = inlined_call_operand.hbm [shape: f32[16,128], index: 0, kind: input, shape index: {}]   ;;  %s322_s1 = inlined_call_operand.hbm [shape: f32[16,128], index: 1, kind: input, shape index: {}]   ;;  %s323_s2 = inlined_call_operand.hbm [shape: f32[1,16,128], index: 2, kind: output, shape index: {0}]   ;;  %s324_s3 = inlined_call_operand.hbm [shape: f32[1,16,128], index: 3, kind: output, shape index: {1}]  }
   0x1   :  { %10 = vsyncpa [#allocation6], 0 }
   0x2   :  { %11 = vsyncpa [#allocation4], 0 }
   0x3   :  { %12 = vsyncpa [#allocation9], 0  ;;  %s234_s12 = smov [#allocation2]   ;;  %s138_s16 = scalar_lea.hbm %s321_s0, 256 }
   0x4   :  { %s22_s13 = sshll.u32 %s234_s12, 4  ;;  %p139_p0 = scmp.ne.s32.totalorder %s321_s0, %s138_s16  ;;  %s23_s13 = int_to_ptr.vmem [resolvable:$true] %s22_s13 }
   0x5   :  { %p142_p1 = scmp.lt.u32.totalorder %s138_s16, %s321_s0 }
   0x7   :  { %p144_p2 = pnand %p142_p1, %p139_p0 }
   0x9   :  { %147 = shalt.err (!%p144_p2)
}
   0xa   :  { %s148_s21 = scalar_lea.vmem %s23_s13, 256  ;;  %p153_p4 = scmp.lt.s32.totalorder %s23_s13, %s23_s13 }
   0xb   :  { %p149_p3 = scmp.ne.s32.totalorder %s23_s13, %s148_s21  ;;  %p154_p5 = scmp.lt.s32.totalorder %s148_s21, %s148_s21 }
   0xd   :  { %p155_p6 = por %p154_p5, %p153_p4 }
   0xf   :  { %p156_p7 = pnand %p155_p6, %p149_p3 }
  0x11   :  { %159 = shalt.err (!%p156_p7)
}
  0x12   :  { %s235_s22 = smov 128   ;;  %s236_s23 = smov 8  }
  0x13   :  { %28 = dma.hbm_to_vmem [thread:$0]  %s321_s0, 256, %s23_s13, [#allocation3], %s235_s22, %s235_s22, %s236_s23  }
  0x14   :  { %s237_s26 = smov [#allocation5]   ;;  %s160_s30 = scalar_lea.hbm %s322_s1, 256 }
  0x15   :  { %s38_s27 = sshll.u32 %s237_s26, 4  ;;  %p161_p8 = scmp.ne.s32.totalorder %s322_s1, %s160_s30  ;;  %s39_s27 = int_to_ptr.vmem [resolvable:$true] %s38_s27 }
  0x16   :  { %p164_p9 = scmp.lt.u32.totalorder %s160_s30, %s322_s1 }
  0x18   :  { %p166_p10 = pnand %p164_p9, %p161_p8 }
  0x1a   :  { %169 = shalt.err (!%p166_p10)
}
  0x1b   :  { %s170_s8 = scalar_lea.vmem %s39_s27, 256  ;;  %p175_p12 = scmp.lt.s32.totalorder %s39_s27, %s39_s27 }
  0x1c   :  { %p171_p11 = scmp.ne.s32.totalorder %s39_s27, %s170_s8  ;;  %p176_p13 = scmp.lt.s32.totalorder %s170_s8, %s170_s8 }
  0x1e   :  { %p177_p0 = por %p176_p13, %p175_p12 }
  0x20   :  { %p178_p1 = pnand %p177_p0, %p171_p11 }
  0x22   :  { %181 = shalt.err (!%p178_p1)
}
  0x23   :  { %44 = dma.hbm_to_vmem [thread:$0]  %s322_s1, 256, %s39_s27, [#allocation6], %s235_s22, %s235_s22, %s236_s23  }
  0x24   :  { %226 = dma.done.wait [#allocation3], 256  }
  0x25   :  { %227 = vsyncadd [#allocation3], 4294967040 }
  0x26   :  { %228 = dma.done.wait [#allocation6], 256  }
  0x27   :  { %229 = vsyncadd [#allocation6], 4294967040  ;;  %v63_v0 = vld [vmem:[#allocation5] sm:$0xff]  ;;  %v67_v1 = vld [vmem:[#allocation2] sm:$0xff]  ;;  %s238_s10 = smov [#allocation8]   ;;  %v239_v5 = vmov 0.0  }
  0x28   :  { %v64_v2 = vld [vmem:[#allocation5 + $0x8] sm:$0xff]  ;;  %s112_s11 = sshll.u32 %s238_s10, 4  ;;  %vm65_vm0 = vcmp.gt.f32.partialorder %v63_v0, 0.0  ;;  %v73_v3 = vsub.f32 %v63_v0, %v67_v1  ;;  %v68_v4 = vld [vmem:[#allocation2 + $0x8] sm:$0xff]  ;;  %s240_s1 = smov [#allocation7]   ;;  %s113_s11 = int_to_ptr.vmem [resolvable:$true] %s112_s11 }
  0x29   :  { %vm66_vm1 = vcmp.gt.f32.partialorder %v64_v2, 0.0  ;;  %v129_v6 = vsel %vm65_vm0, 1.0, %v239_v5  ;;  %v74_v8 = vsub.f32 %v64_v2, %v68_v4  ;;  %s100_s12 = sshll.u32 %s240_s1, 4  ;;  %s182_s13 = scalar_lea.vmem %s113_s11, 256  ;;  %s101_s12 = int_to_ptr.vmem [resolvable:$true] %s100_s12 }
  0x2a   :  { %v130_v7 = vsel %vm66_vm1, 1.0, %v239_v5  ;;  %v75_v9 = vmul.f32 %v129_v6, %v73_v3  ;;  %93 = vst [vmem:[#allocation8] sm:$0xff] %v129_v6  ;;  %p183_p2 = scmp.ne.s32.totalorder %s113_s11, %s182_s13  ;;  %p187_p3 = scmp.lt.s32.totalorder %s113_s11, %s113_s11 }
  0x2b   :  { %v76_v10 = vmul.f32 %v130_v7, %v74_v8  ;;  %94 = vst [vmem:[#allocation8 + $0x8] sm:$0xff] %v130_v7  ;;  %p188_p4 = scmp.lt.s32.totalorder %s182_s13, %s182_s13 }
  0x2c   :  { %v77_v11 = vmul.f32 %v75_v9, %v75_v9 }
  0x2d   :  { %v78_v12 = vmul.f32 %v76_v10, %v76_v10  ;;  %p189_p5 = por %p188_p4, %p187_p3 }
  0x2f   :  { %p190_p6 = pnand %p189_p5, %p183_p2 }
  0x31   :  { %193 = shalt.err (!%p190_p6)
}
  0x32   :  { %s194_s16 = scalar_lea.hbm %s324_s3, 256 }
  0x33   :  { %p195_p7 = scmp.ne.s32.totalorder %s324_s3, %s194_s16  ;;  %p198_p8 = scmp.lt.u32.totalorder %s194_s16, %s324_s3 }
  0x35   :  { %p200_p9 = pnand %p198_p8, %p195_p7 }
  0x37   :  { %203 = shalt.err (!%p200_p9)
}
  0x38   :  { %118 = dma.vmem_to_hbm [thread:$0]  %s113_s11, 256, %s324_s3, [#allocation9], %s235_s22, %s235_s22, %s236_s23   ;;  %85 = vst [vmem:[#allocation7] sm:$0xff] %v77_v11  ;;  %86 = vst [vmem:[#allocation7 + $0x8] sm:$0xff] %v78_v12 }
  0x39   :  { %s204_s25 = scalar_lea.vmem %s101_s12, 256  ;;  %p209_p11 = scmp.lt.s32.totalorder %s101_s12, %s101_s12 }
  0x3a   :  { %p205_p10 = scmp.ne.s32.totalorder %s101_s12, %s204_s25  ;;  %p210_p12 = scmp.lt.s32.totalorder %s204_s25, %s204_s25 }
  0x3c   :  { %p211_p13 = por %p210_p12, %p209_p11 }
  0x3e   :  { %p212_p0 = pnand %p211_p13, %p205_p10 }
  0x40   :  { %215 = shalt.err (!%p212_p0)
}
  0x41   :  { %s216_s28 = scalar_lea.hbm %s323_s2, 256 }
  0x42   :  { %p217_p1 = scmp.ne.s32.totalorder %s323_s2, %s216_s28  ;;  %p220_p2 = scmp.lt.u32.totalorder %s216_s28, %s323_s2 }
  0x44   :  { %p222_p3 = pnand %p220_p2, %p217_p1 }
  0x46   :  { %225 = shalt.err (!%p222_p3)
}
  0x47   :  { %106 = dma.vmem_to_hbm [thread:$0]  %s101_s12, 256, %s323_s2, [#allocation4], %s235_s22, %s235_s22, %s236_s23  }
  0x48   :  { %230 = dma.done.wait [#allocation4], 256  }
  0x49   :  { %231 = vsyncadd [#allocation4], 4294967040 }
  0x4a   :  { %232 = dma.done.wait [#allocation9], 256  }
  0x4b   :  { %233 = vsyncadd [#allocation9], 4294967040 }
  0x4c   :  { %125 = vsyncpa [#allocation3], 1 }
  0x4d   :  { %126 = vsyncpa [#allocation6], 1 }
  0x4e   :  { %127 = vsyncpa [#allocation4], 1 }
  0x4f   :  { %128 = vsyncpa [#allocation9], 1 }

</bundles_post_ra>
